<compile_context>
chip_gen: v5e
topology: v5e:2x2
jax: 0.10.0
libtpu: 0.0.40
codegen_flags: <defaults>
</compile_context>

<pallas_src>
import math

import jax
import jax.numpy as jnp
import numpy as np
from jax.experimental import pallas as pl
from jax.experimental.pallas import tpu as pltpu


def _round_up(v, m):
    return ((v + m - 1) // m) * m


# ------------------------------------------------------------------ kernel --

def _ib_kernel(x_ref, eps_ref,
               w_enc_ref, b_enc_ref,
               w_musd_ref, b_musd_ref,
               w_dec_ref, b_dec_ref,
               z_ref, mu_ref, std_ref, xrec_ref):
    Kp = eps_ref.shape[-1]
    mm = w_enc_ref.dtype            # MXU input dtype (f32 default, bf16 optional)

    x = x_ref[...]

    # encoder: Linear(D -> Dp) + ReLU   (output features zero-padded to 128x)
    h = jnp.dot(x.astype(mm), w_enc_ref[...], preferred_element_type=jnp.float32)
    h = jnp.maximum(h + b_enc_ref[...], 0.0)

    # fused fc_mu | fc_std projection: (TB, Dp) @ (Dp, 2*Kp).
    # Each half is Kp (multiple of 128) wide, so the splits are lane-aligned.
    ms = jnp.dot(h.astype(mm), w_musd_ref[...], preferred_element_type=jnp.float32)
    ms = ms + b_musd_ref[...]
    mu = ms[:, :Kp]
    s = ms[:, Kp:] - 5.0
    # numerically stable softplus (beta=1)
    std = jnp.maximum(s, 0.0) + jnp.log1p(jnp.exp(-jnp.abs(s)))

    # reparameterize
    z = mu + eps_ref[...] * std

    # decoder: Linear(Kp -> Dp)   (padded rows/cols of w_dec are zero)
    xrec = jnp.dot(z.astype(mm), w_dec_ref[...], preferred_element_type=jnp.float32)
    xrec = xrec + b_dec_ref[...]

    # Four separate lane-dense outputs -> unmasked full-vreg stores, no
    # in-kernel concatenate / relayout.
    z_ref[...] = z.astype(z_ref.dtype)
    mu_ref[...] = mu.astype(mu_ref.dtype)
    std_ref[...] = std.astype(std_ref.dtype)
    xrec_ref[...] = xrec.astype(xrec_ref.dtype)


# --------------------------------------------------------------- host prep --

def prepare_ib_params(params, *, use_bf16=False):
    """One-time parameter prep (hoist out of the per-step path).

    Zero-pads feature dims to multiples of 128 lanes (Dp, Kp) and fuses the
    mu|std projection into a single (Dp, 2*Kp) matrix.  `use_bf16=True` casts
    the matmul weights to bf16 (~3x MXU throughput on v6e/v7x, ~1e-2 rel err).
    """
    D, K = params["w_mu"].shape
    Dp, Kp = _round_up(D, 128), _round_up(K, 128)
    mm_dtype = jnp.bfloat16 if use_bf16 else jnp.float32

    def pad2(a, rows, cols):
        r, c = a.shape
        return jnp.pad(a, ((0, rows - r), (0, cols - c)))

    # The encoder contraction dim stays at D: x is never padded host-side.
    w_enc = pad2(params["w_enc"], D, Dp).astype(mm_dtype)
    b_enc = pad2(params["b_enc"], 1, Dp).astype(jnp.float32)
    w_musd = jnp.concatenate([pad2(params["w_mu"], Dp, Kp),
                              pad2(params["w_std"], Dp, Kp)], axis=1).astype(mm_dtype)
    b_musd = jnp.concatenate([pad2(params["b_mu"], 1, Kp),
                              pad2(params["b_std"], 1, Kp)], axis=1).astype(jnp.float32)
    w_dec = pad2(params["w_dec"], Kp, Dp).astype(mm_dtype)
    b_dec = pad2(params["b_dec"], 1, Dp).astype(jnp.float32)
    return dict(w_enc=w_enc, b_enc=b_enc, w_musd=w_musd, b_musd=b_musd,
                w_dec=w_dec, b_dec=b_dec, D=D, K=K, Dp=Dp, Kp=Kp)


def _vmem_budget():
    """(tiling budget, vmem_limit_bytes), derived from the actual chip."""
    try:
        cap = int(pltpu.get_tpu_info().vmem_capacity_bytes)
    except Exception:
        cap = 64 * 1024 * 1024          # conservative (v7x per-TC VMEM)
    return int(cap * 0.45), int(cap * 0.75)


def _pick_batch_tile(B, D, Dp, Kp, budget_bytes, max_tb=1024):
    """Largest multiple-of-8 batch tile whose VMEM footprint (single-buffered
    resident weights + double-buffered activation tiles + f32 temps) fits."""
    weight_bytes = 4 * (D * Dp + Dp + Dp * 2 * Kp + 2 * Kp + Kp * Dp + Dp)
    per_row = 4 * (2 * (D + Kp + 3 * Kp + Dp)      # x, eps | z, mu, std, xrec (2 bufs)
                   + (Dp + 2 * Kp + 3 * Kp))       # h, ms, softplus temps
    # TODO(synk): when weight_bytes > budget_bytes // 2 (huge D on v7x), tile
    # the feature/contraction dims with a second "arbitrary" grid axis instead
    # of keeping all weights resident.
    tb = min(max_tb, max(8, _round_up(B, 8)))
    tb = max(8, (tb // 8) * 8)
    while tb > 8 and weight_bytes + tb * per_row > budget_bytes:
        tb = max(8, ((tb // 2) // 8) * 8)
    return tb


def _build_call(B, D, Dp, Kp, TB, n_tiles, vmem_limit, weight_buffering):
    act = lambda n: pl.BlockSpec((TB, n), lambda i: (i, 0))
    res_kwargs = ({"pipeline_mode": pl.Buffered(weight_buffering)}
                  if weight_buffering is not None else {})
    res = lambda m, n: pl.BlockSpec((m, n), lambda i: (0, 0), **res_kwargs)

    grid_spec = pltpu.PrefetchScalarGridSpec(
        num_scalar_prefetch=0,
        grid=(n_tiles,),
        in_specs=[
            act(D),              # x   (lane dim == full array dim, unpadded)
            act(Kp),             # eps (zero-padded to Kp lanes)
            res(D, Dp),          # w_enc
            res(1, Dp),          # b_enc
            res(Dp, 2 * Kp),     # w_mu | w_std  (fused)
            res(1, 2 * Kp),      # b_mu | b_std
            res(Kp, Dp),         # w_dec
            res(1, Dp),          # b_dec
        ],
        out_specs=(act(Kp), act(Kp), act(Kp), act(Dp)),   # z, mu, std, x_rec
    )
    flops = 2 * B * (D * Dp + Dp * 2 * Kp + Kp * Dp)
    bytes_accessed = 4 * (B * (D + Kp + 3 * Kp + Dp)
                          + D * Dp + Dp * 2 * Kp + Kp * Dp + 4 * Dp + 2 * Kp)
    return pl.pallas_call(
        _ib_kernel,
        out_shape=(
            jax.ShapeDtypeStruct((B, Kp), jnp.float32),   # z
            jax.ShapeDtypeStruct((B, Kp), jnp.float32),   # mu
            jax.ShapeDtypeStruct((B, Kp), jnp.float32),   # std
            jax.ShapeDtypeStruct((B, Dp), jnp.float32),   # x_reconstructed
        ),
        grid_spec=grid_spec,
        compiler_params=pltpu.CompilerParams(
            dimension_semantics=("parallel",),
            vmem_limit_bytes=vmem_limit,
        ),
        cost_estimate=pl.CostEstimate(
            flops=flops, transcendentals=2 * B * Kp, bytes_accessed=bytes_accessed),
    )


def information_bottleneck_forward(x, eps, prepared, *, block_b=None):
    """x: (B, input_dim), eps: (B, bottleneck_dim) -> (z, x_rec, mu, std)."""
    B, D = x.shape
    K, Dp, Kp = prepared["K"], prepared["Dp"], prepared["Kp"]
    assert D == prepared["D"], "x feature dim does not match prepared params"

    # eps only needs zero columns when K is not lane-aligned; padded z columns
    # are sliced off below and cannot affect x_rec (padded w_dec rows are 0).
    if eps.shape[-1] != Kp:
        eps = jnp.pad(eps, ((0, 0), (0, Kp - eps.shape[-1])))

    budget, vmem_limit = _vmem_budget()
    if block_b is not None:
        TB = max(8, (int(block_b) // 8) * 8)       # keep the (8,128) sublane rule
    else:
        TB = _pick_batch_tile(B, D, Dp, Kp, budget)
    if B >= 16:
        # >= 2 grid steps so the "parallel" batch axis can split across v7x's
        # two TensorCores; grid-step overhead (~0.35 us) stays negligible.
        TB = min(TB, _round_up(pl.cdiv(B, 2), 8))
    TB = min(TB, _round_up(B, 8))
    n_tiles = pl.cdiv(B, TB)   # ragged tail uses Pallas partial-block masking (no jnp.pad of x)

    args = (x, eps, prepared["w_enc"], prepared["b_enc"],
            prepared["w_musd"], prepared["b_musd"],
            prepared["w_dec"], prepared["b_dec"])
    try:
        z, mu, std, xrec = _build_call(B, D, Dp, Kp, TB, n_tiles, vmem_limit,
                                       weight_buffering=1)(*args)
    except Exception:
        # Fallback for jax versions without BlockSpec pipeline_mode support:
        # default double-buffered resident weights (correct, slightly more VMEM).
        z, mu, std, xrec = _build_call(B, D, Dp, Kp, TB, n_tiles, vmem_limit,
                                       weight_buffering=None)(*args)

    if Kp != K:
        z, mu, std = z[:, :K], mu[:, :K], std[:, :K]
    if Dp != D:
        xrec = xrec[:, :D]
    return z, xrec, mu, std


# -------------------------------------------------------------------- demo --

def _init_linear(key, in_dim, out_dim):
    # PyTorch nn.Linear default init: U(-1/sqrt(in), 1/sqrt(in))
    kw, kb = jax.random.split(key)
    bound = 1.0 / math.sqrt(in_dim)
    w = jax.random.uniform(kw, (in_dim, out_dim), jnp.float32, -bound, bound)
    b = jax.random.uniform(kb, (1, out_dim), jnp.float32, -bound, bound)
    return w, b


def _reference(x, eps, p):
    h = jnp.maximum(x @ p["w_enc"] + p["b_enc"], 0.0)
    mu = h @ p["w_mu"] + p["b_mu"]
    std = jax.nn.softplus(h @ p["w_std"] + p["b_std"] - 5.0)
    z = mu + eps * std
    xrec = z @ p["w_dec"] + p["b_dec"]
    return z, xrec, mu, std


if __name__ == "__main__":
    B, input_dim, bottleneck_dim = 8, 32, 16

    root = jax.random.PRNGKey(0)
    k_x, k_eps, k_enc, k_mu, k_std, k_dec = jax.random.split(root, 6)

    x = jax.random.normal(k_x, (B, input_dim), jnp.float32)
    # torch.randn_like(std) is host-supplied so the kernel stays deterministic.
    eps = jax.random.normal(k_eps, (B, bottleneck_dim), jnp.float32)

    w_enc, b_enc = _init_linear(k_enc, input_dim, input_dim)
    w_mu, b_mu = _init_linear(k_mu, input_dim, bottleneck_dim)
    w_std, b_std = _init_linear(k_std, input_dim, bottleneck_dim)
    w_dec, b_dec = _init_linear(k_dec, bottleneck_dim, input_dim)

    params = dict(w_enc=w_enc, b_enc=b_enc, w_mu=w_mu, b_mu=b_mu,
                  w_std=w_std, b_std=b_std, w_dec=w_dec, b_dec=b_dec)

    prepared = prepare_ib_params(params)      # one-time prep, outside the step path
    z, x_rec, mu, std = information_bottleneck_forward(x, eps, prepared)
    jax.block_until_ready((z, x_rec, mu, std))

    z_r, xrec_r, mu_r, std_r = _reference(x, eps, params)
    np.testing.assert_allclose(np.asarray(z), np.asarray(z_r), rtol=1e-5, atol=1e-5)
    np.testing.assert_allclose(np.asarray(x_rec), np.asarray(xrec_r), rtol=1e-5, atol=1e-5)
    np.testing.assert_allclose(np.asarray(mu), np.asarray(mu_r), rtol=1e-5, atol=1e-5)
    np.testing.assert_allclose(np.asarray(std), np.asarray(std_r), rtol=1e-5, atol=1e-5)

    print("KERNEL_OK")
</pallas_src>

<mosaic_0001>
module attributes {stable_mosaic.version = 11 : i64} {
  func.func @_ib_kernel(%arg0: i32, %arg1: memref<8x32xf32, #tpu.memory_space<vmem>>, %arg2: memref<8x128xf32, #tpu.memory_space<vmem>>, %arg3: memref<32x128xf32, #tpu.memory_space<vmem>>, %arg4: memref<1x128xf32, #tpu.memory_space<vmem>>, %arg5: memref<128x256xf32, #tpu.memory_space<vmem>>, %arg6: memref<1x256xf32, #tpu.memory_space<vmem>>, %arg7: memref<128x128xf32, #tpu.memory_space<vmem>>, %arg8: memref<1x128xf32, #tpu.memory_space<vmem>>, %arg9: memref<8x128xf32, #tpu.memory_space<vmem>>, %arg10: memref<8x128xf32, #tpu.memory_space<vmem>>, %arg11: memref<8x128xf32, #tpu.memory_space<vmem>>, %arg12: memref<8x128xf32, #tpu.memory_space<vmem>>) attributes {dimension_semantics = [#tpu.dimension_semantics<parallel>], iteration_bounds = array<i64: 1>, scalar_prefetch = 0 : i64, scratch_operands = 0 : i64, tpu.core_type = #tpu.core_type<tc>, window_params = [{transform_indices = @transform_0, window_bounds = array<i64: 8, 32>}, {transform_indices = @transform_1, window_bounds = array<i64: 8, 128>}, {pipeline_mode = #tpu.pipeline_mode<synchronous>, transform_indices = @transform_2, window_bounds = array<i64: 32, 128>}, {pipeline_mode = #tpu.pipeline_mode<synchronous>, transform_indices = @transform_3, window_bounds = array<i64: 1, 128>}, {pipeline_mode = #tpu.pipeline_mode<synchronous>, transform_indices = @transform_4, window_bounds = array<i64: 128, 256>}, {pipeline_mode = #tpu.pipeline_mode<synchronous>, transform_indices = @transform_5, window_bounds = array<i64: 1, 256>}, {pipeline_mode = #tpu.pipeline_mode<synchronous>, transform_indices = @transform_6, window_bounds = array<i64: 128, 128>}, {pipeline_mode = #tpu.pipeline_mode<synchronous>, transform_indices = @transform_7, window_bounds = array<i64: 1, 128>}, {transform_indices = @transform_8, window_bounds = array<i64: 8, 128>}, {transform_indices = @transform_9, window_bounds = array<i64: 8, 128>}, {transform_indices = @transform_10, window_bounds = array<i64: 8, 128>}, {transform_indices = @transform_11, window_bounds = array<i64: 8, 128>}]} {
    %c0 = arith.constant 0 : index
    %c0_0 = arith.constant 0 : index
    %0 = vector.load %arg1[%c0, %c0_0] : memref<8x32xf32, #tpu.memory_space<vmem>>, vector<8x32xf32>
    %c0_1 = arith.constant 0 : index
    %c0_2 = arith.constant 0 : index
    %1 = vector.load %arg3[%c0_1, %c0_2] : memref<32x128xf32, #tpu.memory_space<vmem>>, vector<32x128xf32>
    %cst = arith.constant dense<0.000000e+00> : vector<8x128xf32>
    %2 = tpu.matmul %0, %1, %cst {dimension_numbers = #tpu.dot_dimension_numbers<[1], [0], [0], [1], [0, 0, 1, 1], [], []>} : vector<8x32xf32>, vector<32x128xf32>, vector<8x128xf32> -> vector<8x128xf32>
    %c0_3 = arith.constant 0 : index
    %c0_4 = arith.constant 0 : index
    %3 = vector.load %arg4[%c0_3, %c0_4] : memref<1x128xf32, #tpu.memory_space<vmem>>, vector<1x128xf32>
    %4 = vector.broadcast %3 : vector<1x128xf32> to vector<8x128xf32>
    %5 = arith.addf %2, %4 : vector<8x128xf32>
    %cst_5 = arith.constant 0.000000e+00 : f32
    %6 = vector.broadcast %cst_5 : f32 to vector<8x128xf32>
    %7 = arith.maximumf %5, %6 : vector<8x128xf32>
    %c0_6 = arith.constant 0 : index
    %c0_7 = arith.constant 0 : index
    %8 = vector.load %arg5[%c0_6, %c0_7] : memref<128x256xf32, #tpu.memory_space<vmem>>, vector<128x256xf32>
    %cst_8 = arith.constant dense<0.000000e+00> : vector<8x256xf32>
    %9 = tpu.matmul %7, %8, %cst_8 {dimension_numbers = #tpu.dot_dimension_numbers<[1], [0], [0], [1], [0, 0, 1, 1], [], []>} : vector<8x128xf32>, vector<128x256xf32>, vector<8x256xf32> -> vector<8x256xf32>
    %c0_9 = arith.constant 0 : index
    %c0_10 = arith.constant 0 : index
    %10 = vector.load %arg6[%c0_9, %c0_10] : memref<1x256xf32, #tpu.memory_space<vmem>>, vector<1x256xf32>
    %11 = vector.broadcast %10 : vector<1x256xf32> to vector<8x256xf32>
    %12 = arith.addf %9, %11 : vector<8x256xf32>
    %13 = vector.extract_strided_slice %12 {offsets = [0, 0], sizes = [8, 128], strides = [1, 1]} : vector<8x256xf32> to vector<8x128xf32>
    %14 = vector.extract_strided_slice %12 {offsets = [0, 128], sizes = [8, 128], strides = [1, 1]} : vector<8x256xf32> to vector<8x128xf32>
    %cst_11 = arith.constant 5.000000e+00 : f32
    %15 = vector.broadcast %cst_11 : f32 to vector<8x128xf32>
    %16 = arith.subf %14, %15 : vector<8x128xf32>
    %cst_12 = arith.constant 0.000000e+00 : f32
    %17 = vector.broadcast %cst_12 : f32 to vector<8x128xf32>
    %18 = arith.maximumf %16, %17 : vector<8x128xf32>
    %19 = math.absf %16 : vector<8x128xf32>
    %cst_13 = arith.constant 0.000000e+00 : f32
    %20 = vector.broadcast %cst_13 : f32 to vector<8x128xf32>
    %21 = arith.subf %20, %19 : vector<8x128xf32>
    %22 = math.exp %21 : vector<8x128xf32>
    %23 = math.log1p %22 : vector<8x128xf32>
    %24 = arith.addf %18, %23 : vector<8x128xf32>
    %c0_14 = arith.constant 0 : index
    %c0_15 = arith.constant 0 : index
    %25 = vector.load %arg2[%c0_14, %c0_15] : memref<8x128xf32, #tpu.memory_space<vmem>>, vector<8x128xf32>
    %26 = arith.mulf %25, %24 : vector<8x128xf32>
    %27 = arith.addf %13, %26 : vector<8x128xf32>
    %c0_16 = arith.constant 0 : index
    %c0_17 = arith.constant 0 : index
    %28 = vector.load %arg7[%c0_16, %c0_17] : memref<128x128xf32, #tpu.memory_space<vmem>>, vector<128x128xf32>
    %cst_18 = arith.constant dense<0.000000e+00> : vector<8x128xf32>
    %29 = tpu.matmul %27, %28, %cst_18 {dimension_numbers = #tpu.dot_dimension_numbers<[1], [0], [0], [1], [0, 0, 1, 1], [], []>} : vector<8x128xf32>, vector<128x128xf32>, vector<8x128xf32> -> vector<8x128xf32>
    %c0_19 = arith.constant 0 : index
    %c0_20 = arith.constant 0 : index
    %30 = vector.load %arg8[%c0_19, %c0_20] : memref<1x128xf32, #tpu.memory_space<vmem>>, vector<1x128xf32>
    %31 = vector.broadcast %30 : vector<1x128xf32> to vector<8x128xf32>
    %32 = arith.addf %29, %31 : vector<8x128xf32>
    %c0_21 = arith.constant 0 : index
    %c0_22 = arith.constant 0 : index
    %33 = vector.load %arg9[%c0_21, %c0_22] : memref<8x128xf32, #tpu.memory_space<vmem>>, vector<8x128xf32>
    tpu.vector_store %arg9[%c0_21, %c0_22], %27 {strides = array<i32>} : memref<8x128xf32, #tpu.memory_space<vmem>>, vector<8x128xf32>,
    %c0_23 = arith.constant 0 : index
    %c0_24 = arith.constant 0 : index
    %34 = vector.load %arg10[%c0_23, %c0_24] : memref<8x128xf32, #tpu.memory_space<vmem>>, vector<8x128xf32>
    tpu.vector_store %arg10[%c0_23, %c0_24], %13 {strides = array<i32>} : memref<8x128xf32, #tpu.memory_space<vmem>>, vector<8x128xf32>,
    %c0_25 = arith.constant 0 : index
    %c0_26 = arith.constant 0 : index
    %35 = vector.load %arg11[%c0_25, %c0_26] : memref<8x128xf32, #tpu.memory_space<vmem>>, vector<8x128xf32>
    tpu.vector_store %arg11[%c0_25, %c0_26], %24 {strides = array<i32>} : memref<8x128xf32, #tpu.memory_space<vmem>>, vector<8x128xf32>,
    %c0_27 = arith.constant 0 : index
    %c0_28 = arith.constant 0 : index
    %36 = vector.load %arg12[%c0_27, %c0_28] : memref<8x128xf32, #tpu.memory_space<vmem>>, vector<8x128xf32>
    tpu.vector_store %arg12[%c0_27, %c0_28], %32 {strides = array<i32>} : memref<8x128xf32, #tpu.memory_space<vmem>>, vector<8x128xf32>,
    return
  }
  func.func @transform_0(%arg0: i32) -> (i32, i32) {
    %c0_i32 = arith.constant 0 : i32
    %c0_i32_0 = arith.constant 0 : i32
    return %arg0, %c0_i32 : i32, i32
  }
  func.func @transform_1(%arg0: i32) -> (i32, i32) {
    %c0_i32 = arith.constant 0 : i32
    %c0_i32_0 = arith.constant 0 : i32
    return %arg0, %c0_i32 : i32, i32
  }
  func.func @transform_2(%arg0: i32) -> (i32, i32) {
    %c0_i32 = arith.constant 0 : i32
    %c0_i32_0 = arith.constant 0 : i32
    %c0_i32_1 = arith.constant 0 : i32
    return %c0_i32, %c0_i32_0 : i32, i32
  }
  func.func @transform_3(%arg0: i32) -> (i32, i32) {
    %c0_i32 = arith.constant 0 : i32
    %c0_i32_0 = arith.constant 0 : i32
    %c0_i32_1 = arith.constant 0 : i32
    return %c0_i32, %c0_i32_0 : i32, i32
  }
  func.func @transform_4(%arg0: i32) -> (i32, i32) {
    %c0_i32 = arith.constant 0 : i32
    %c0_i32_0 = arith.constant 0 : i32
    %c0_i32_1 = arith.constant 0 : i32
    return %c0_i32, %c0_i32_0 : i32, i32
  }
  func.func @transform_5(%arg0: i32) -> (i32, i32) {
    %c0_i32 = arith.constant 0 : i32
    %c0_i32_0 = arith.constant 0 : i32
    %c0_i32_1 = arith.constant 0 : i32
    return %c0_i32, %c0_i32_0 : i32, i32
  }
  func.func @transform_6(%arg0: i32) -> (i32, i32) {
    %c0_i32 = arith.constant 0 : i32
    %c0_i32_0 = arith.constant 0 : i32
    %c0_i32_1 = arith.constant 0 : i32
    return %c0_i32, %c0_i32_0 : i32, i32
  }
  func.func @transform_7(%arg0: i32) -> (i32, i32) {
    %c0_i32 = arith.constant 0 : i32
    %c0_i32_0 = arith.constant 0 : i32
    %c0_i32_1 = arith.constant 0 : i32
    return %c0_i32, %c0_i32_0 : i32, i32
  }
  func.func @transform_8(%arg0: i32) -> (i32, i32) {
    %c0_i32 = arith.constant 0 : i32
    %c0_i32_0 = arith.constant 0 : i32
    return %arg0, %c0_i32 : i32, i32
  }
  func.func @transform_9(%arg0: i32) -> (i32, i32) {
    %c0_i32 = arith.constant 0 : i32
    %c0_i32_0 = arith.constant 0 : i32
    return %arg0, %c0_i32 : i32, i32
  }
  func.func @transform_10(%arg0: i32) -> (i32, i32) {
    %c0_i32 = arith.constant 0 : i32
    %c0_i32_0 = arith.constant 0 : i32
    return %arg0, %c0_i32 : i32, i32
  }
  func.func @transform_11(%arg0: i32) -> (i32, i32) {
    %c0_i32 = arith.constant 0 : i32
    %c0_i32_0 = arith.constant 0 : i32
    return %arg0, %c0_i32 : i32, i32
  }
}

module attributes {stable_mosaic.version = 11 : i64} {
  func.func @_ib_kernel(%arg0: i32, %arg1: memref<8x32xf32, #tpu.memory_space<vmem>>, %arg2: memref<8x128xf32, #tpu.memory_space<vmem>>, %arg3: memref<32x128xf32, #tpu.memory_space<vmem>>, %arg4: memref<1x128xf32, #tpu.memory_space<vmem>>, %arg5: memref<128x256xf32, #tpu.memory_space<vmem>>, %arg6: memref<1x256xf32, #tpu.memory_space<vmem>>, %arg7: memref<128x128xf32, #tpu.memory_space<vmem>>, %arg8: memref<1x128xf32, #tpu.memory_space<vmem>>, %arg9: memref<8x128xf32, #tpu.memory_space<vmem>>, %arg10: memref<8x128xf32, #tpu.memory_space<vmem>>, %arg11: memref<8x128xf32, #tpu.memory_space<vmem>>, %arg12: memref<8x128xf32, #tpu.memory_space<vmem>>) attributes {dimension_semantics = [#tpu.dimension_semantics<parallel>], iteration_bounds = array<i64: 1>, scalar_prefetch = 0 : i64, scratch_operands = 0 : i64, tpu.core_type = #tpu.core_type<tc>, window_params = [{transform_indices = @transform_0, window_bounds = array<i64: 8, 32>}, {transform_indices = @transform_1, window_bounds = array<i64: 8, 128>}, {pipeline_mode = #tpu.pipeline_mode<synchronous>, transform_indices = @transform_2, window_bounds = array<i64: 32, 128>}, {pipeline_mode = #tpu.pipeline_mode<synchronous>, transform_indices = @transform_3, window_bounds = array<i64: 1, 128>}, {pipeline_mode = #tpu.pipeline_mode<synchronous>, transform_indices = @transform_4, window_bounds = array<i64: 128, 256>}, {pipeline_mode = #tpu.pipeline_mode<synchronous>, transform_indices = @transform_5, window_bounds = array<i64: 1, 256>}, {pipeline_mode = #tpu.pipeline_mode<synchronous>, transform_indices = @transform_6, window_bounds = array<i64: 128, 128>}, {pipeline_mode = #tpu.pipeline_mode<synchronous>, transform_indices = @transform_7, window_bounds = array<i64: 1, 128>}, {transform_indices = @transform_8, window_bounds = array<i64: 8, 128>}, {transform_indices = @transform_9, window_bounds = array<i64: 8, 128>}, {transform_indices = @transform_10, window_bounds = array<i64: 8, 128>}, {transform_indices = @transform_11, window_bounds = array<i64: 8, 128>}]} {
    %c0 = arith.constant 0 : index
    %c0_0 = arith.constant 0 : index
    %0 = vector.load %arg1[%c0, %c0_0] : memref<8x32xf32, #tpu.memory_space<vmem>>, vector<8x32xf32>
    %c0_1 = arith.constant 0 : index
    %c0_2 = arith.constant 0 : index
    %1 = vector.load %arg3[%c0_1, %c0_2] : memref<32x128xf32, #tpu.memory_space<vmem>>, vector<32x128xf32>
    %cst = arith.constant dense<0.000000e+00> : vector<8x128xf32>
    %2 = tpu.matmul %0, %1, %cst {dimension_numbers = #tpu.dot_dimension_numbers<[1], [0], [0], [1], [0, 0, 1, 1], [], []>} : vector<8x32xf32>, vector<32x128xf32>, vector<8x128xf32> -> vector<8x128xf32>
    %c0_3 = arith.constant 0 : index
    %c0_4 = arith.constant 0 : index
    %3 = vector.load %arg4[%c0_3, %c0_4] : memref<1x128xf32, #tpu.memory_space<vmem>>, vector<1x128xf32>
    %4 = vector.broadcast %3 : vector<1x128xf32> to vector<8x128xf32>
    %5 = arith.addf %2, %4 : vector<8x128xf32>
    %cst_5 = arith.constant 0.000000e+00 : f32
    %6 = vector.broadcast %cst_5 : f32 to vector<8x128xf32>
    %7 = arith.maximumf %5, %6 : vector<8x128xf32>
    %c0_6 = arith.constant 0 : index
    %c0_7 = arith.constant 0 : index
    %8 = vector.load %arg5[%c0_6, %c0_7] : memref<128x256xf32, #tpu.memory_space<vmem>>, vector<128x256xf32>
    %cst_8 = arith.constant dense<0.000000e+00> : vector<8x256xf32>
    %9 = tpu.matmul %7, %8, %cst_8 {dimension_numbers = #tpu.dot_dimension_numbers<[1], [0], [0], [1], [0, 0, 1, 1], [], []>} : vector<8x128xf32>, vector<128x256xf32>, vector<8x256xf32> -> vector<8x256xf32>
    %c0_9 = arith.constant 0 : index
    %c0_10 = arith.constant 0 : index
    %10 = vector.load %arg6[%c0_9, %c0_10] : memref<1x256xf32, #tpu.memory_space<vmem>>, vector<1x256xf32>
    %11 = vector.broadcast %10 : vector<1x256xf32> to vector<8x256xf32>
    %12 = arith.addf %9, %11 : vector<8x256xf32>
    %13 = vector.extract_strided_slice %12 {offsets = [0, 0], sizes = [8, 128], strides = [1, 1]} : vector<8x256xf32> to vector<8x128xf32>
    %14 = vector.extract_strided_slice %12 {offsets = [0, 128], sizes = [8, 128], strides = [1, 1]} : vector<8x256xf32> to vector<8x128xf32>
    %cst_11 = arith.constant 5.000000e+00 : f32
    %15 = vector.broadcast %cst_11 : f32 to vector<8x128xf32>
    %16 = arith.subf %14, %15 : vector<8x128xf32>
    %cst_12 = arith.constant 0.000000e+00 : f32
    %17 = vector.broadcast %cst_12 : f32 to vector<8x128xf32>
    %18 = arith.maximumf %16, %17 : vector<8x128xf32>
    %19 = math.absf %16 : vector<8x128xf32>
    %cst_13 = arith.constant 0.000000e+00 : f32
    %20 = vector.broadcast %cst_13 : f32 to vector<8x128xf32>
    %21 = arith.subf %20, %19 : vector<8x128xf32>
    %22 = math.exp %21 : vector<8x128xf32>
    %23 = math.log1p %22 : vector<8x128xf32>
    %24 = arith.addf %18, %23 : vector<8x128xf32>
    %c0_14 = arith.constant 0 : index
    %c0_15 = arith.constant 0 : index
    %25 = vector.load %arg2[%c0_14, %c0_15] : memref<8x128xf32, #tpu.memory_space<vmem>>, vector<8x128xf32>
    %26 = arith.mulf %25, %24 : vector<8x128xf32>
    %27 = arith.addf %13, %26 : vector<8x128xf32>
    %c0_16 = arith.constant 0 : index
    %c0_17 = arith.constant 0 : index
    %28 = vector.load %arg7[%c0_16, %c0_17] : memref<128x128xf32, #tpu.memory_space<vmem>>, vector<128x128xf32>
    %cst_18 = arith.constant dense<0.000000e+00> : vector<8x128xf32>
    %29 = tpu.matmul %27, %28, %cst_18 {dimension_numbers = #tpu.dot_dimension_numbers<[1], [0], [0], [1], [0, 0, 1, 1], [], []>} : vector<8x128xf32>, vector<128x128xf32>, vector<8x128xf32> -> vector<8x128xf32>
    %c0_19 = arith.constant 0 : index
    %c0_20 = arith.constant 0 : index
    %30 = vector.load %arg8[%c0_19, %c0_20] : memref<1x128xf32, #tpu.memory_space<vmem>>, vector<1x128xf32>
    %31 = vector.broadcast %30 : vector<1x128xf32> to vector<8x128xf32>
    %32 = arith.addf %29, %31 : vector<8x128xf32>
    %c0_21 = arith.constant 0 : index
    %c0_22 = arith.constant 0 : index
    %33 = vector.load %arg9[%c0_21, %c0_22] : memref<8x128xf32, #tpu.memory_space<vmem>>, vector<8x128xf32>
    tpu.vector_store %arg9[%c0_21, %c0_22], %27 {strides = array<i32>} : memref<8x128xf32, #tpu.memory_space<vmem>>, vector<8x128xf32>,
    %c0_23 = arith.constant 0 : index
    %c0_24 = arith.constant 0 : index
    %34 = vector.load %arg10[%c0_23, %c0_24] : memref<8x128xf32, #tpu.memory_space<vmem>>, vector<8x128xf32>
    tpu.vector_store %arg10[%c0_23, %c0_24], %13 {strides = array<i32>} : memref<8x128xf32, #tpu.memory_space<vmem>>, vector<8x128xf32>,
    %c0_25 = arith.constant 0 : index
    %c0_26 = arith.constant 0 : index
    %35 = vector.load %arg11[%c0_25, %c0_26] : memref<8x128xf32, #tpu.memory_space<vmem>>, vector<8x128xf32>
    tpu.vector_store %arg11[%c0_25, %c0_26], %24 {strides = array<i32>} : memref<8x128xf32, #tpu.memory_space<vmem>>, vector<8x128xf32>,
    %c0_27 = arith.constant 0 : index
    %c0_28 = arith.constant 0 : index
    %36 = vector.load %arg12[%c0_27, %c0_28] : memref<8x128xf32, #tpu.memory_space<vmem>>, vector<8x128xf32>
    tpu.vector_store %arg12[%c0_27, %c0_28], %32 {strides = array<i32>} : memref<8x128xf32, #tpu.memory_space<vmem>>, vector<8x128xf32>,
    return
  }
  func.func @transform_0(%arg0: i32) -> (i32, i32) {
    %c0_i32 = arith.constant 0 : i32
    %c0_i32_0 = arith.constant 0 : i32
    return %arg0, %c0_i32 : i32, i32
  }
  func.func @transform_1(%arg0: i32) -> (i32, i32) {
    %c0_i32 = arith.constant 0 : i32
    %c0_i32_0 = arith.constant 0 : i32
    return %arg0, %c0_i32 : i32, i32
  }
  func.func @transform_2(%arg0: i32) -> (i32, i32) {
    %c0_i32 = arith.constant 0 : i32
    %c0_i32_0 = arith.constant 0 : i32
    %c0_i32_1 = arith.constant 0 : i32
    return %c0_i32, %c0_i32_0 : i32, i32
  }
  func.func @transform_3(%arg0: i32) -> (i32, i32) {
    %c0_i32 = arith.constant 0 : i32
    %c0_i32_0 = arith.constant 0 : i32
    %c0_i32_1 = arith.constant 0 : i32
    return %c0_i32, %c0_i32_0 : i32, i32
  }
  func.func @transform_4(%arg0: i32) -> (i32, i32) {
    %c0_i32 = arith.constant 0 : i32
    %c0_i32_0 = arith.constant 0 : i32
    %c0_i32_1 = arith.constant 0 : i32
    return %c0_i32, %c0_i32_0 : i32, i32
  }
  func.func @transform_5(%arg0: i32) -> (i32, i32) {
    %c0_i32 = arith.constant 0 : i32
    %c0_i32_0 = arith.constant 0 : i32
    %c0_i32_1 = arith.constant 0 : i32
    return %c0_i32, %c0_i32_0 : i32, i32
  }
  func.func @transform_6(%arg0: i32) -> (i32, i32) {
    %c0_i32 = arith.constant 0 : i32
    %c0_i32_0 = arith.constant 0 : i32
    %c0_i32_1 = arith.constant 0 : i32
    return %c0_i32, %c0_i32_0 : i32, i32
  }
  func.func @transform_7(%arg0: i32) -> (i32, i32) {
    %c0_i32 = arith.constant 0 : i32
    %c0_i32_0 = arith.constant 0 : i32
    %c0_i32_1 = arith.constant 0 : i32
    return %c0_i32, %c0_i32_0 : i32, i32
  }
  func.func @transform_8(%arg0: i32) -> (i32, i32) {
    %c0_i32 = arith.constant 0 : i32
    %c0_i32_0 = arith.constant 0 : i32
    return %arg0, %c0_i32 : i32, i32
  }
  func.func @transform_9(%arg0: i32) -> (i32, i32) {
    %c0_i32 = arith.constant 0 : i32
    %c0_i32_0 = arith.constant 0 : i32
    return %arg0, %c0_i32 : i32, i32
  }
  func.func @transform_10(%arg0: i32) -> (i32, i32) {
    %c0_i32 = arith.constant 0 : i32
    %c0_i32_0 = arith.constant 0 : i32
    return %arg0, %c0_i32 : i32, i32
  }
  func.func @transform_11(%arg0: i32) -> (i32, i32) {
    %c0_i32 = arith.constant 0 : i32
    %c0_i32_0 = arith.constant 0 : i32
    return %arg0, %c0_i32 : i32, i32
  }
}

</mosaic_0001>

<bundles_post_ra>
// kernel: tpu_custom_call.1
= control target key start
LH: loop header
LB: loop body
LE: loop exit
PB: predicated region body
PF: predicated region fallthrough
CT: control target
= control target key end

     0   :  { %17 = vsyncpa [#allocation3], 0  ;;  %s709_s0 = inlined_call_operand.hbm [shape: f32[8,32], index: 0, kind: input, shape index: {}]   ;;  %s710_s1 = inlined_call_operand.hbm [shape: f32[8,128], index: 1, kind: input, shape index: {}]   ;;  %s711_s2 = inlined_call_operand.hbm [shape: f32[32,128], index: 2, kind: input, shape index: {}]   ;;  %s712_s3 = inlined_call_operand.vmem [shape: f32[1,128], index: 3, kind: input, shape index: {}]   ;;  %s713_s4 = inlined_call_operand.hbm [shape: f32[128,256], index: 4, kind: input, shape index: {}]   ;;  %s714_s5 = inlined_call_operand.vmem [shape: f32[1,256], index: 5, kind: input, shape index: {}]   ;;  %s715_s6 = inlined_call_operand.hbm [shape: f32[128,128], index: 6, kind: input, shape index: {}]   ;;  %s716_s7 = inlined_call_operand.vmem [shape: f32[1,128], index: 7, kind: input, shape index: {}]   ;;  %s717_s8 = inlined_call_operand.hbm [shape: f32[8,128], index: 8, kind: output, shape index: {0}]   ;;  %s718_s9 = inlined_call_operand.hbm [shape: f32[8,128], index: 9, kind: output, shape index: {1}]   ;;  %s719_s10 = inlined_call_operand.hbm [shape: f32[8,128], index: 10, kind: output, shape index: {2}]   ;;  %s720_s11 = inlined_call_operand.hbm [shape: f32[8,128], index: 11, kind: output, shape index: {3}]  }
   0x1   :  { %18 = vsyncpa [#allocation6], 0 }
   0x2   :  { %19 = vsyncpa [#allocation9], 0 }
   0x3   :  { %20 = vsyncpa [#allocation4], 0 }
   0x4   :  { %21 = vsyncpa [#allocation13], 0  ;;  %s39_s19 = sshll.u32 %s710_s1, 4  ;;  %s40_s19 = int_to_ptr.hbm [resolvable:$true] %s39_s19 }
   0x5   :  { %22 = vsyncpa [#allocation16], 0  ;;  %s600_s20 = smov [#allocation5]   ;;  %s64_s24 = sshll.u32 %s713_s4, 4  ;;  %s65_s24 = int_to_ptr.hbm [resolvable:$true] %s64_s24 }
   0x6   :  { %s41_s21 = sshll.u32 %s600_s20, 4  ;;  %s601_s25 = smov [#allocation8]   ;;  %s42_s21 = int_to_ptr.vmem [resolvable:$true] %s41_s21 }
   0x7   :  { %44 = dma.hbm_to_vmem [thread:$0]  %s40_s19, 128, %s42_s21, [#allocation6]  }
   0x8   :  { %s66_s26 = sshll.u32 %s601_s25, 4  ;;  %s602_s27 = smov 256   ;;  %s67_s26 = int_to_ptr.vmem [resolvable:$true] %s66_s26 }
   0x9   :  { %s603_s28 = smov 16   ;;  %s28_s1 = sshll.u32 %s709_s0, 4  ;;  %s29_s1 = int_to_ptr.hbm [resolvable:$true] %s28_s1 }
   0xa   :  { %72 = dma.hbm_to_vmem [thread:$0]  %s65_s24, 4096, %s67_s26, [#allocation9], %s602_s27, %s602_s27, %s603_s28  }
   0xb   :  { %s604_s12 = smov [#allocation2]   ;;  %s49_s4 = sshll.u32 %s711_s2, 4  ;;  %s50_s4 = int_to_ptr.hbm [resolvable:$true] %s49_s4 }
   0xc   :  { %s30_s13 = sshll.u32 %s604_s12, 4  ;;  %s605_s16 = smov [#allocation7]   ;;  %s31_s13 = int_to_ptr.vmem [resolvable:$true] %s30_s13 }
   0xd   :  { %33 = dma.hbm_to_vmem [thread:$0]  %s29_s1, 128, %s31_s13, [#allocation3]  }
   0xe   :  { %s51_s17 = sshll.u32 %s605_s16, 4  ;;  %s606_s18 = smov 128   ;;  %s52_s17 = int_to_ptr.vmem [resolvable:$true] %s51_s17 }
   0xf   :  { %s607_s19 = smov 8   ;;  %s79_s0 = sshll.u32 %s715_s6, 4  ;;  %s80_s0 = int_to_ptr.hbm [resolvable:$true] %s79_s0 }
  0x10   :  { %57 = dma.hbm_to_vmem [thread:$0]  %s50_s4, 512, %s52_s17, [#allocation6], %s606_s18, %s606_s18, %s607_s19  }
  0x11   :  { %s608_s22 = smov [#allocation10]  }
  0x12   :  { %s81_s23 = sshll.u32 %s608_s22, 4  ;;  %s82_s23 = int_to_ptr.vmem [resolvable:$true] %s81_s23 }
  0x13   :  { %87 = dma.hbm_to_vmem [thread:$0]  %s80_s0, 2048, %s82_s23, [#allocation9], %s606_s18, %s606_s18, %s607_s19  }
  0x14   :  { %588 = dma.done.wait [#allocation3], 128  }
  0x15   :  { %589 = vsyncadd [#allocation3], 4294967168 }
  0x16   :  { %590 = dma.done.wait [#allocation6], 640  }
  0x17   :  { %591 = vsyncadd [#allocation6], 4294966656 }
  0x18   :  { %592 = dma.done.wait [#allocation9], 6144  }
  0x19   :  { %593 = vsyncadd [#allocation9], 4294961152  ;;  %v114_v0 = vld [vmem:[#allocation7 + $0x18] sm:$0xff]  ;;  %v113_v1 = vld [vmem:[#allocation7 + $0x10] sm:$0xff]  ;;  %vm119_vm0 = vcmask 261120   ;;  %s303_s28 = sshll.u32 %s718_s9, 4  ;;  %s304_s28 = int_to_ptr.hbm [resolvable:$true] %s303_s28 }
  0x1a   :  { %135 = vmatpush.msra.mxu0 %v114_v0  ;;  %v112_v2 = vld [vmem:[#allocation7 + $0x8] sm:$0xff]  ;;  %v174_v3 = vld [vmem:[#allocation8 + $0xf0] sm:$0xff]  ;;  %v175_v4 = vld [vmem:[#allocation8 + $0xf8] sm:$0xff]  ;;  %s292_s1 = sshll.u32 %s717_s8, 4  ;;  %s610_s12 = smov [#allocation11]   ;;  %s293_s1 = int_to_ptr.hbm [resolvable:$true] %s292_s1 }
  0x1b   :  { %182 = vmatpush.msra.mxu1 %v174_v3  ;;  %v172_v5 = vld [vmem:[#allocation8 + $0xe0] sm:$0xff]  ;;  %v173_v6 = vld [vmem:[#allocation8 + $0xe8] sm:$0xff]  ;;  %202 = vmatpush.msra.mxu2 %v175_v4  ;;  %v170_v7 = vld [vmem:[#allocation8 + $0xd0] sm:$0xff]  ;;  %s290_s13 = sshll.u32 %s610_s12, 4  ;;  %s611_s14 = smov [#allocation14]   ;;  %s291_s13 = int_to_ptr.vmem [resolvable:$true] %s290_s13 }
  0x1c   :  { %136 = vmatpush.msra.mxu0 %v113_v1  ;;  %v111_v8 = vld [vmem:[#allocation7] sm:$0xff]  ;;  %v171_v9 = vld [vmem:[#allocation8 + $0xd8] sm:$0xff]  ;;  %v110_v10 = vld [vmem:[#allocation2] sm:$0xff]  ;;  %s312_s15 = sshll.u32 %s611_s14, 4  ;;  %s314_s17 = sshll.u32 %s719_s10, 4  ;;  %s313_s15 = int_to_ptr.vmem [resolvable:$true] %s312_s15  ;;  %s315_s17 = int_to_ptr.hbm [resolvable:$true] %s314_s17 }
  0x1d   :  { %183 = vmatpush.msra.mxu1 %v172_v5  ;;  %203 = vmatpush.msra.mxu2 %v173_v6  ;;  %v168_v11 = vld [vmem:[#allocation8 + $0xc0] sm:$0xff]  ;;  %v169_v12 = vld [vmem:[#allocation8 + $0xc8] sm:$0xff]  ;;  %v166_v13 = vld [vmem:[#allocation8 + $0xb0] sm:$0xff]  ;;  %s612_s19 = smov [#allocation15]   ;;  %s325_s0 = sshll.u32 %s720_s11, 4  ;;  %s326_s0 = int_to_ptr.hbm [resolvable:$true] %s325_s0 }
  0x1e   :  { %137 = vmatpush.msra.mxu0 %v112_v2  ;;  %v167_v14 = vld [vmem:[#allocation8 + $0xb8] sm:$0xff]  ;;  %v164_v15 = vld [vmem:[#allocation8 + $0xa0] sm:$0xff]  ;;  %v165_v16 = vld [vmem:[#allocation8 + $0xa8] sm:$0xff]  ;;  %s323_s8 = sshll.u32 %s612_s19, 4  ;;  %s324_s8 = int_to_ptr.vmem [resolvable:$true] %s323_s8 }
  0x1f   :  { %184 = vmatpush.msra.mxu1 %v170_v7  ;;  %204 = vmatpush.msra.mxu2 %v171_v9  ;;  %v162_v17 = vld [vmem:[#allocation8 + $0x90] sm:$0xff]  ;;  %v163_v18 = vld [vmem:[#allocation8 + $0x98] sm:$0xff]  ;;  %v160_v19 = vld [vmem:[#allocation8 + $0x80] sm:$0xff] }
  0x20   :  { %138 = vmatpush.msra.mxu0 %v111_v8  ;;  %v161_v20 = vld [vmem:[#allocation8 + $0x88] sm:$0xff]  ;;  %v158_v21 = vld [vmem:[#allocation8 + $0x70] sm:$0xff]  ;;  %v159_v22 = vld [vmem:[#allocation8 + $0x78] sm:$0xff] }
  0x21   :  { %351 = vmatmul.msk.f32.vlgmr.msra.gmra.mxu0 %vm119_vm0, %v110_v10  ;;  %185 = vmatpush.msra.mxu1 %v168_v11  ;;  %v156_v23 = vld [vmem:[#allocation8 + $0x60] sm:$0xff]  ;;  %v157_v24 = vld [vmem:[#allocation8 + $0x68] sm:$0xff]  ;;  %v154_v25 = vld [vmem:[#allocation8 + $0x50] sm:$0xff] }
  0x22   :  { %205 = vmatpush.msra.mxu2 %v169_v12  ;;  %v155_v26 = vld [vmem:[#allocation8 + $0x58] sm:$0xff]  ;;  %v152_v27 = vld [vmem:[#allocation8 + $0x40] sm:$0xff]  ;;  %v153_v28 = vld [vmem:[#allocation8 + $0x48] sm:$0xff] }
  0x23   :  { %186 = vmatpush.msra.mxu1 %v166_v13  ;;  %v150_v29 = vld [vmem:[#allocation8 + $0x30] sm:$0xff]  ;;  %v151_v30 = vld [vmem:[#allocation8 + $0x38] sm:$0xff]  ;;  %v148_v31 = vld [vmem:[#allocation8 + $0x20] sm:$0xff] }
  0x24   :  { %206 = vmatpush.msra.mxu2 %v167_v14  ;;  %v149_v32 = vld [vmem:[#allocation8 + $0x28] sm:$0xff]  ;;  %v146_v33 = vld [vmem:[#allocation8 + $0x10] sm:$0xff]  ;;  %v147_v34 = vld [vmem:[#allocation8 + $0x18] sm:$0xff] }
  0x25   :  { %187 = vmatpush.msra.mxu1 %v164_v15  ;;  %v144_v35 = vld [vmem:[#allocation8] sm:$0xff]  ;;  %v145_v36 = vld [vmem:[#allocation8 + $0x8] sm:$0xff]  ;;  %v366_v37 = vld [vmem:[%s712_s3] ss:$0 sm:$0xff] }
  0x26   :  { %207 = vmatpush.msra.mxu2 %v165_v16  ;;  %v256_v41 = vld [vmem:[#allocation10 + $0x78] sm:$0xff]  ;;  %v255_v42 = vld [vmem:[#allocation10 + $0x70] sm:$0xff]  ;;  %v254_v43 = vld [vmem:[#allocation10 + $0x68] sm:$0xff] }
  0x27   :  { %188 = vmatpush.msra.mxu1 %v162_v17  ;;  %261 = vmatpush.msra.mxu3 %v256_v41  ;;  %v253_v44 = vld [vmem:[#allocation10 + $0x60] sm:$0xff]  ;;  %v252_v45 = vld [vmem:[#allocation10 + $0x58] sm:$0xff]  ;;  %v251_v46 = vld [vmem:[#allocation10 + $0x50] sm:$0xff] }
  0x28   :  { %208 = vmatpush.msra.mxu2 %v163_v18  ;;  %v250_v47 = vld [vmem:[#allocation10 + $0x48] sm:$0xff]  ;;  %v249_v48 = vld [vmem:[#allocation10 + $0x40] sm:$0xff]  ;;  %v176_v49 = vld [vmem:[%s714_s5] sm:$0x3]  ;;  %s609_s5 = smov [#allocation12]  }
  0x29   :  { %189 = vmatpush.msra.mxu1 %v160_v19  ;;  %262 = vmatpush.msra.mxu3 %v255_v42  ;;  %v248_v50 = vld [vmem:[#allocation10 + $0x38] sm:$0xff]  ;;  %v247_v51 = vld [vmem:[#allocation10 + $0x30] sm:$0xff]  ;;  %v178_v52 = vperm.slane %v176_v49, 0  ;;  %v246_v53 = vld [vmem:[#allocation10 + $0x28] sm:$0xff]  ;;  %v179_v58 = vperm.slane %v176_v49, 1  ;;  %s301_s25 = sshll.u32 %s609_s5, 4  ;;  %s302_s25 = int_to_ptr.vmem [resolvable:$true] %s301_s25 }
  0x2a   :  { %209 = vmatpush.msra.mxu2 %v161_v20  ;;  %v245_v55 = vld [vmem:[#allocation10 + $0x20] sm:$0xff]  ;;  %v244_v57 = vld [vmem:[#allocation10 + $0x18] sm:$0xff]  ;;  %v243_v59 = vld [vmem:[#allocation10 + $0x10] sm:$0xff] }
  0x2b   :  { %190 = vmatpush.msra.mxu1 %v158_v21  ;;  %263 = vmatpush.msra.mxu3 %v254_v43  ;;  %v242_v61 = vld [vmem:[#allocation10 + $0x8] sm:$0xff]  ;;  %v241_v62 = vld [vmem:[#allocation10] sm:$0xff]  ;;  %v238_v14 = vld [vmem:[#allocation5] sm:$0xff] }
  0x2c   :  { %210 = vmatpush.msra.mxu2 %v159_v22  ;;  %v367_v18 = vld [vmem:[%s716_s7] ss:$0 sm:$0xff] }
  0x2d   :  { %191 = vmatpush.msra.mxu1 %v156_v23  ;;  %264 = vmatpush.msra.mxu3 %v253_v44 }
  0x2e   :  { %211 = vmatpush.msra.mxu2 %v157_v24 }
  0x2f   :  { %192 = vmatpush.msra.mxu1 %v154_v25  ;;  %265 = vmatpush.msra.mxu3 %v252_v45 }
  0x30   :  { %212 = vmatpush.msra.mxu2 %v155_v26 }
  0x31   :  { %193 = vmatpush.msra.mxu1 %v152_v27  ;;  %266 = vmatpush.msra.mxu3 %v251_v46 }
  0x32   :  { %213 = vmatpush.msra.mxu2 %v153_v28 }
  0x33   :  { %194 = vmatpush.msra.mxu1 %v150_v29  ;;  %267 = vmatpush.msra.mxu3 %v250_v47 }
  0x34   :  { %214 = vmatpush.msra.mxu2 %v151_v30 }
  0x35   :  { %195 = vmatpush.msra.mxu1 %v148_v31  ;;  %268 = vmatpush.msra.mxu3 %v249_v48 }
  0x36   :  { %215 = vmatpush.msra.mxu2 %v149_v32 }
  0x37   :  { %196 = vmatpush.msra.mxu1 %v146_v33  ;;  %269 = vmatpush.msra.mxu3 %v248_v50 }
  0x38   :  { %216 = vmatpush.msra.mxu2 %v147_v34 }
  0x39   :  { %197 = vmatpush.msra.mxu1 %v144_v35  ;;  %270 = vmatpush.msra.mxu3 %v247_v51 }
  0x3a   :  { %217 = vmatpush.msra.mxu2 %v145_v36 }
  0x3b   :  { %271 = vmatpush.msra.mxu3 %v246_v53 }
  0x3d   :  { %272 = vmatpush.msra.mxu3 %v245_v55 }
  0x3f   :  { %273 = vmatpush.msra.mxu3 %v244_v57 }
  0x41   :  { %274 = vmatpush.msra.mxu3 %v243_v59 }
  0x43   :  { %275 = vmatpush.msra.mxu3 %v242_v61 }
  0x45   :  { %276 = vmatpush.msra.mxu3 %v241_v62 }
  0x9e   :  { %v140_v38 = vpop.f32.mrf.mxu0 }
  0x9f   :  { %v141_v39 = vadd.f32 %v366_v37, %v140_v38 }
  0xa1   :  { %v143_v40 = vmax.f32 %v141_v39, 0.0 }
  0xa3   :  { %198 = vmatmul.f32.vlgmr.msra.gmra.mxu1 %v143_v40  ;;  %218 = vmatmul.f32.vlgmr.msra.gmra.mxu2 %v143_v40 }
 0x120   :  { %v199_v54 = vpop.f32.mrf.mxu1 }
 0x121   :  { %v200_v56 = vadd.f32 %v199_v54, %v178_v52 }
 0x123   :  { %282 = vst [vmem:[#allocation12] sm:$0xff] %v200_v56 }
 0x124   :  { %306 = dma.vmem_to_hbm [thread:$0]  %s302_s25, 128, %s304_s28, [#allocation13]  }
 0x126   :  { %v219_v60 = vpop.f32.mrf.mxu2 }
 0x127   :  { %v220_v63 = vadd.f32 %v219_v60, %v179_v58 }
 0x129   :  { %v352_v0 = vadd.f32 -5.0, %v220_v63 }
 0x12b   :  { %v224_v1 = vand.u32 2147483647, %v352_v0  ;;  %v223_v12 = vmax.f32 %v352_v0, 0.0 }
 0x12d   :  { %v225_v2 = vsub.f32 0.0, %v224_v1 }
 0x12f   :  { %v226_v3 = vmul.f32 1.442695, %v225_v2 }
 0x131   :  { %368 = vpow2.f32 %v226_v3 }
 0x137   :  { %v369_v4 = vpop.eup %368 }
 0x138   :  { %v228_v5 = vadd.f32 1.0, %v369_v4  ;;  %v231_v6 = vmul.f32 -0.5, %v369_v4  ;;  %v234_v8 = vand.u32 2147483647, %v369_v4 }
 0x13a   :  { %370 = vlog2.f32 %v228_v5  ;;  %v232_v7 = vadd.f32 1.0, %v231_v6  ;;  %vm235_vm1 = vcmp.lt.f32.partialorder %v234_v8, 0.0004427343 }
 0x13c   :  { %v233_v11 = vmul.f32 %v369_v4, %v232_v7 }
 0x140   :  { %v371_v9 = vpop.eup %370 }
 0x141   :  { %v230_v10 = vmul.f32 0.6931472, %v371_v9 }
 0x143   :  { %v236_v13 = vsel %vm235_vm1, %v233_v11, %v230_v10 }
 0x144   :  { %v237_v15 = vadd.f32 %v236_v13, %v223_v12 }
 0x146   :  { %283 = vst [vmem:[#allocation14] sm:$0xff] %v237_v15  ;;  %v239_v16 = vmul.f32 %v238_v14, %v237_v15 }
 0x147   :  { %317 = dma.vmem_to_hbm [thread:$0]  %s313_s15, 128, %s315_s17, [#allocation13]  }
 0x148   :  { %v240_v17 = vadd.f32 %v239_v16, %v200_v56 }
 0x14a   :  { %277 = vmatmul.f32.vlgmr.msra.gmra.mxu3 %v240_v17  ;;  %281 = vst [vmem:[#allocation11] sm:$0xff] %v240_v17 }
 0x14b   :  { %295 = dma.vmem_to_hbm [thread:$0]  %s291_s13, 128, %s293_s1, [#allocation4]  }
 0x1cd   :  { %v278_v19 = vpop.f32.mrf.mxu3 }
 0x1ce   :  { %v279_v20 = vadd.f32 %v367_v18, %v278_v19 }
 0x1d0   :  { %284 = vst [vmem:[#allocation15] sm:$0xff] %v279_v20 }
 0x1d1   :  { %328 = dma.vmem_to_hbm [thread:$0]  %s324_s8, 128, %s326_s0, [#allocation16]  }
 0x1d2   :  { %594 = dma.done.wait [#allocation4], 128  }
 0x1d3   :  { %595 = vsyncadd [#allocation4], 4294967168 }
 0x1d4   :  { %596 = dma.done.wait [#allocation13], 256  }
 0x1d5   :  { %597 = vsyncadd [#allocation13], 4294967040 }
 0x1d6   :  { %598 = dma.done.wait [#allocation16], 128  }
 0x1d7   :  { %599 = vsyncadd [#allocation16], 4294967168 }
 0x1d8   :  { %345 = vsyncpa [#allocation3], 1 }
 0x1d9   :  { %346 = vsyncpa [#allocation6], 1 }
 0x1da   :  { %347 = vsyncpa [#allocation9], 1 }
 0x1db   :  { %348 = vsyncpa [#allocation4], 1 }
 0x1dc   :  { %349 = vsyncpa [#allocation13], 1 }
 0x1dd   :  { %350 = vsyncpa [#allocation16], 1 }

// kernel: tpu_custom_call.1
= control target key start
LH: loop header
LB: loop body
LE: loop exit
PB: predicated region body
PF: predicated region fallthrough
CT: control target
= control target key end

     0   :  { %17 = vsyncpa [#allocation3], 0  ;;  %s709_s0 = inlined_call_operand.hbm [shape: f32[8,32], index: 0, kind: input, shape index: {}]   ;;  %s710_s1 = inlined_call_operand.hbm [shape: f32[8,128], index: 1, kind: input, shape index: {}]   ;;  %s711_s2 = inlined_call_operand.hbm [shape: f32[32,128], index: 2, kind: input, shape index: {}]   ;;  %s712_s3 = inlined_call_operand.vmem [shape: f32[1,128], index: 3, kind: input, shape index: {}]   ;;  %s713_s4 = inlined_call_operand.hbm [shape: f32[128,256], index: 4, kind: input, shape index: {}]   ;;  %s714_s5 = inlined_call_operand.vmem [shape: f32[1,256], index: 5, kind: input, shape index: {}]   ;;  %s715_s6 = inlined_call_operand.hbm [shape: f32[128,128], index: 6, kind: input, shape index: {}]   ;;  %s716_s7 = inlined_call_operand.vmem [shape: f32[1,128], index: 7, kind: input, shape index: {}]   ;;  %s717_s8 = inlined_call_operand.hbm [shape: f32[8,128], index: 8, kind: output, shape index: {0}]   ;;  %s718_s9 = inlined_call_operand.hbm [shape: f32[8,128], index: 9, kind: output, shape index: {1}]   ;;  %s719_s10 = inlined_call_operand.hbm [shape: f32[8,128], index: 10, kind: output, shape index: {2}]   ;;  %s720_s11 = inlined_call_operand.hbm [shape: f32[8,128], index: 11, kind: output, shape index: {3}]  }
   0x1   :  { %18 = vsyncpa [#allocation6], 0 }
   0x2   :  { %19 = vsyncpa [#allocation9], 0 }
   0x3   :  { %20 = vsyncpa [#allocation4], 0 }
   0x4   :  { %21 = vsyncpa [#allocation13], 0  ;;  %s39_s19 = sshll.u32 %s710_s1, 4  ;;  %s40_s19 = int_to_ptr.hbm [resolvable:$true] %s39_s19 }
   0x5   :  { %22 = vsyncpa [#allocation16], 0  ;;  %s600_s20 = smov [#allocation5]   ;;  %s64_s24 = sshll.u32 %s713_s4, 4  ;;  %s65_s24 = int_to_ptr.hbm [resolvable:$true] %s64_s24 }
   0x6   :  { %s41_s21 = sshll.u32 %s600_s20, 4  ;;  %s601_s25 = smov [#allocation8]   ;;  %s42_s21 = int_to_ptr.vmem [resolvable:$true] %s41_s21 }
   0x7   :  { %44 = dma.hbm_to_vmem [thread:$0]  %s40_s19, 128, %s42_s21, [#allocation6]  }
   0x8   :  { %s66_s26 = sshll.u32 %s601_s25, 4  ;;  %s602_s27 = smov 256   ;;  %s67_s26 = int_to_ptr.vmem [resolvable:$true] %s66_s26 }
   0x9   :  { %s603_s28 = smov 16   ;;  %s28_s1 = sshll.u32 %s709_s0, 4  ;;  %s29_s1 = int_to_ptr.hbm [resolvable:$true] %s28_s1 }
   0xa   :  { %72 = dma.hbm_to_vmem [thread:$0]  %s65_s24, 4096, %s67_s26, [#allocation9], %s602_s27, %s602_s27, %s603_s28  }
   0xb   :  { %s604_s12 = smov [#allocation2]   ;;  %s49_s4 = sshll.u32 %s711_s2, 4  ;;  %s50_s4 = int_to_ptr.hbm [resolvable:$true] %s49_s4 }
   0xc   :  { %s30_s13 = sshll.u32 %s604_s12, 4  ;;  %s605_s16 = smov [#allocation7]   ;;  %s31_s13 = int_to_ptr.vmem [resolvable:$true] %s30_s13 }
   0xd   :  { %33 = dma.hbm_to_vmem [thread:$0]  %s29_s1, 128, %s31_s13, [#allocation3]  }
   0xe   :  { %s51_s17 = sshll.u32 %s605_s16, 4  ;;  %s606_s18 = smov 128   ;;  %s52_s17 = int_to_ptr.vmem [resolvable:$true] %s51_s17 }
   0xf   :  { %s607_s19 = smov 8   ;;  %s79_s0 = sshll.u32 %s715_s6, 4  ;;  %s80_s0 = int_to_ptr.hbm [resolvable:$true] %s79_s0 }
  0x10   :  { %57 = dma.hbm_to_vmem [thread:$0]  %s50_s4, 512, %s52_s17, [#allocation6], %s606_s18, %s606_s18, %s607_s19  }
  0x11   :  { %s608_s22 = smov [#allocation10]  }
  0x12   :  { %s81_s23 = sshll.u32 %s608_s22, 4  ;;  %s82_s23 = int_to_ptr.vmem [resolvable:$true] %s81_s23 }
  0x13   :  { %87 = dma.hbm_to_vmem [thread:$0]  %s80_s0, 2048, %s82_s23, [#allocation9], %s606_s18, %s606_s18, %s607_s19  }
  0x14   :  { %588 = dma.done.wait [#allocation3], 128  }
  0x15   :  { %589 = vsyncadd [#allocation3], 4294967168 }
  0x16   :  { %590 = dma.done.wait [#allocation6], 640  }
  0x17   :  { %591 = vsyncadd [#allocation6], 4294966656 }
  0x18   :  { %592 = dma.done.wait [#allocation9], 6144  }
  0x19   :  { %593 = vsyncadd [#allocation9], 4294961152  ;;  %v114_v0 = vld [vmem:[#allocation7 + $0x18] sm:$0xff]  ;;  %v113_v1 = vld [vmem:[#allocation7 + $0x10] sm:$0xff]  ;;  %vm119_vm0 = vcmask 261120   ;;  %s303_s28 = sshll.u32 %s718_s9, 4  ;;  %s304_s28 = int_to_ptr.hbm [resolvable:$true] %s303_s28 }
  0x1a   :  { %135 = vmatpush.msra.mxu0 %v114_v0  ;;  %v112_v2 = vld [vmem:[#allocation7 + $0x8] sm:$0xff]  ;;  %v174_v3 = vld [vmem:[#allocation8 + $0xf0] sm:$0xff]  ;;  %v175_v4 = vld [vmem:[#allocation8 + $0xf8] sm:$0xff]  ;;  %s292_s1 = sshll.u32 %s717_s8, 4  ;;  %s610_s12 = smov [#allocation11]   ;;  %s293_s1 = int_to_ptr.hbm [resolvable:$true] %s292_s1 }
  0x1b   :  { %182 = vmatpush.msra.mxu1 %v174_v3  ;;  %v172_v5 = vld [vmem:[#allocation8 + $0xe0] sm:$0xff]  ;;  %v173_v6 = vld [vmem:[#allocation8 + $0xe8] sm:$0xff]  ;;  %202 = vmatpush.msra.mxu2 %v175_v4  ;;  %v170_v7 = vld [vmem:[#allocation8 + $0xd0] sm:$0xff]  ;;  %s290_s13 = sshll.u32 %s610_s12, 4  ;;  %s611_s14 = smov [#allocation14]   ;;  %s291_s13 = int_to_ptr.vmem [resolvable:$true] %s290_s13 }
  0x1c   :  { %136 = vmatpush.msra.mxu0 %v113_v1  ;;  %v111_v8 = vld [vmem:[#allocation7] sm:$0xff]  ;;  %v171_v9 = vld [vmem:[#allocation8 + $0xd8] sm:$0xff]  ;;  %v110_v10 = vld [vmem:[#allocation2] sm:$0xff]  ;;  %s312_s15 = sshll.u32 %s611_s14, 4  ;;  %s314_s17 = sshll.u32 %s719_s10, 4  ;;  %s313_s15 = int_to_ptr.vmem [resolvable:$true] %s312_s15  ;;  %s315_s17 = int_to_ptr.hbm [resolvable:$true] %s314_s17 }
  0x1d   :  { %183 = vmatpush.msra.mxu1 %v172_v5  ;;  %203 = vmatpush.msra.mxu2 %v173_v6  ;;  %v168_v11 = vld [vmem:[#allocation8 + $0xc0] sm:$0xff]  ;;  %v169_v12 = vld [vmem:[#allocation8 + $0xc8] sm:$0xff]  ;;  %v166_v13 = vld [vmem:[#allocation8 + $0xb0] sm:$0xff]  ;;  %s612_s19 = smov [#allocation15]   ;;  %s325_s0 = sshll.u32 %s720_s11, 4  ;;  %s326_s0 = int_to_ptr.hbm [resolvable:$true] %s325_s0 }
  0x1e   :  { %137 = vmatpush.msra.mxu0 %v112_v2  ;;  %v167_v14 = vld [vmem:[#allocation8 + $0xb8] sm:$0xff]  ;;  %v164_v15 = vld [vmem:[#allocation8 + $0xa0] sm:$0xff]  ;;  %v165_v16 = vld [vmem:[#allocation8 + $0xa8] sm:$0xff]  ;;  %s323_s8 = sshll.u32 %s612_s19, 4  ;;  %s324_s8 = int_to_ptr.vmem [resolvable:$true] %s323_s8 }
  0x1f   :  { %184 = vmatpush.msra.mxu1 %v170_v7  ;;  %204 = vmatpush.msra.mxu2 %v171_v9  ;;  %v162_v17 = vld [vmem:[#allocation8 + $0x90] sm:$0xff]  ;;  %v163_v18 = vld [vmem:[#allocation8 + $0x98] sm:$0xff]  ;;  %v160_v19 = vld [vmem:[#allocation8 + $0x80] sm:$0xff] }
  0x20   :  { %138 = vmatpush.msra.mxu0 %v111_v8  ;;  %v161_v20 = vld [vmem:[#allocation8 + $0x88] sm:$0xff]  ;;  %v158_v21 = vld [vmem:[#allocation8 + $0x70] sm:$0xff]  ;;  %v159_v22 = vld [vmem:[#allocation8 + $0x78] sm:$0xff] }
  0x21   :  { %351 = vmatmul.msk.f32.vlgmr.msra.gmra.mxu0 %vm119_vm0, %v110_v10  ;;  %185 = vmatpush.msra.mxu1 %v168_v11  ;;  %v156_v23 = vld [vmem:[#allocation8 + $0x60] sm:$0xff]  ;;  %v157_v24 = vld [vmem:[#allocation8 + $0x68] sm:$0xff]  ;;  %v154_v25 = vld [vmem:[#allocation8 + $0x50] sm:$0xff] }
  0x22   :  { %205 = vmatpush.msra.mxu2 %v169_v12  ;;  %v155_v26 = vld [vmem:[#allocation8 + $0x58] sm:$0xff]  ;;  %v152_v27 = vld [vmem:[#allocation8 + $0x40] sm:$0xff]  ;;  %v153_v28 = vld [vmem:[#allocation8 + $0x48] sm:$0xff] }
  0x23   :  { %186 = vmatpush.msra.mxu1 %v166_v13  ;;  %v150_v29 = vld [vmem:[#allocation8 + $0x30] sm:$0xff]  ;;  %v151_v30 = vld [vmem:[#allocation8 + $0x38] sm:$0xff]  ;;  %v148_v31 = vld [vmem:[#allocation8 + $0x20] sm:$0xff] }
  0x24   :  { %206 = vmatpush.msra.mxu2 %v167_v14  ;;  %v149_v32 = vld [vmem:[#allocation8 + $0x28] sm:$0xff]  ;;  %v146_v33 = vld [vmem:[#allocation8 + $0x10] sm:$0xff]  ;;  %v147_v34 = vld [vmem:[#allocation8 + $0x18] sm:$0xff] }
  0x25   :  { %187 = vmatpush.msra.mxu1 %v164_v15  ;;  %v144_v35 = vld [vmem:[#allocation8] sm:$0xff]  ;;  %v145_v36 = vld [vmem:[#allocation8 + $0x8] sm:$0xff]  ;;  %v366_v37 = vld [vmem:[%s712_s3] ss:$0 sm:$0xff] }
  0x26   :  { %207 = vmatpush.msra.mxu2 %v165_v16  ;;  %v256_v41 = vld [vmem:[#allocation10 + $0x78] sm:$0xff]  ;;  %v255_v42 = vld [vmem:[#allocation10 + $0x70] sm:$0xff]  ;;  %v254_v43 = vld [vmem:[#allocation10 + $0x68] sm:$0xff] }
  0x27   :  { %188 = vmatpush.msra.mxu1 %v162_v17  ;;  %261 = vmatpush.msra.mxu3 %v256_v41  ;;  %v253_v44 = vld [vmem:[#allocation10 + $0x60] sm:$0xff]  ;;  %v252_v45 = vld [vmem:[#allocation10 + $0x58] sm:$0xff]  ;;  %v251_v46 = vld [vmem:[#allocation10 + $0x50] sm:$0xff] }
  0x28   :  { %208 = vmatpush.msra.mxu2 %v163_v18  ;;  %v250_v47 = vld [vmem:[#allocation10 + $0x48] sm:$0xff]  ;;  %v249_v48 = vld [vmem:[#allocation10 + $0x40] sm:$0xff]  ;;  %v176_v49 = vld [vmem:[%s714_s5] sm:$0x3]  ;;  %s609_s5 = smov [#allocation12]  }
  0x29   :  { %189 = vmatpush.msra.mxu1 %v160_v19  ;;  %262 = vmatpush.msra.mxu3 %v255_v42  ;;  %v248_v50 = vld [vmem:[#allocation10 + $0x38] sm:$0xff]  ;;  %v247_v51 = vld [vmem:[#allocation10 + $0x30] sm:$0xff]  ;;  %v178_v52 = vperm.slane %v176_v49, 0  ;;  %v246_v53 = vld [vmem:[#allocation10 + $0x28] sm:$0xff]  ;;  %v179_v58 = vperm.slane %v176_v49, 1  ;;  %s301_s25 = sshll.u32 %s609_s5, 4  ;;  %s302_s25 = int_to_ptr.vmem [resolvable:$true] %s301_s25 }
  0x2a   :  { %209 = vmatpush.msra.mxu2 %v161_v20  ;;  %v245_v55 = vld [vmem:[#allocation10 + $0x20] sm:$0xff]  ;;  %v244_v57 = vld [vmem:[#allocation10 + $0x18] sm:$0xff]  ;;  %v243_v59 = vld [vmem:[#allocation10 + $0x10] sm:$0xff] }
  0x2b   :  { %190 = vmatpush.msra.mxu1 %v158_v21  ;;  %263 = vmatpush.msra.mxu3 %v254_v43  ;;  %v242_v61 = vld [vmem:[#allocation10 + $0x8] sm:$0xff]  ;;  %v241_v62 = vld [vmem:[#allocation10] sm:$0xff]  ;;  %v238_v14 = vld [vmem:[#allocation5] sm:$0xff] }
  0x2c   :  { %210 = vmatpush.msra.mxu2 %v159_v22  ;;  %v367_v18 = vld [vmem:[%s716_s7] ss:$0 sm:$0xff] }
  0x2d   :  { %191 = vmatpush.msra.mxu1 %v156_v23  ;;  %264 = vmatpush.msra.mxu3 %v253_v44 }
  0x2e   :  { %211 = vmatpush.msra.mxu2 %v157_v24 }
  0x2f   :  { %192 = vmatpush.msra.mxu1 %v154_v25  ;;  %265 = vmatpush.msra.mxu3 %v252_v45 }
  0x30   :  { %212 = vmatpush.msra.mxu2 %v155_v26 }
  0x31   :  { %193 = vmatpush.msra.mxu1 %v152_v27  ;;  %266 = vmatpush.msra.mxu3 %v251_v46 }
  0x32   :  { %213 = vmatpush.msra.mxu2 %v153_v28 }
  0x33   :  { %194 = vmatpush.msra.mxu1 %v150_v29  ;;  %267 = vmatpush.msra.mxu3 %v250_v47 }
  0x34   :  { %214 = vmatpush.msra.mxu2 %v151_v30 }
  0x35   :  { %195 = vmatpush.msra.mxu1 %v148_v31  ;;  %268 = vmatpush.msra.mxu3 %v249_v48 }
  0x36   :  { %215 = vmatpush.msra.mxu2 %v149_v32 }
  0x37   :  { %196 = vmatpush.msra.mxu1 %v146_v33  ;;  %269 = vmatpush.msra.mxu3 %v248_v50 }
  0x38   :  { %216 = vmatpush.msra.mxu2 %v147_v34 }
  0x39   :  { %197 = vmatpush.msra.mxu1 %v144_v35  ;;  %270 = vmatpush.msra.mxu3 %v247_v51 }
  0x3a   :  { %217 = vmatpush.msra.mxu2 %v145_v36 }
  0x3b   :  { %271 = vmatpush.msra.mxu3 %v246_v53 }
  0x3d   :  { %272 = vmatpush.msra.mxu3 %v245_v55 }
  0x3f   :  { %273 = vmatpush.msra.mxu3 %v244_v57 }
  0x41   :  { %274 = vmatpush.msra.mxu3 %v243_v59 }
  0x43   :  { %275 = vmatpush.msra.mxu3 %v242_v61 }
  0x45   :  { %276 = vmatpush.msra.mxu3 %v241_v62 }
  0x9e   :  { %v140_v38 = vpop.f32.mrf.mxu0 }
  0x9f   :  { %v141_v39 = vadd.f32 %v366_v37, %v140_v38 }
  0xa1   :  { %v143_v40 = vmax.f32 %v141_v39, 0.0 }
  0xa3   :  { %198 = vmatmul.f32.vlgmr.msra.gmra.mxu1 %v143_v40  ;;  %218 = vmatmul.f32.vlgmr.msra.gmra.mxu2 %v143_v40 }
 0x120   :  { %v199_v54 = vpop.f32.mrf.mxu1 }
 0x121   :  { %v200_v56 = vadd.f32 %v199_v54, %v178_v52 }
 0x123   :  { %282 = vst [vmem:[#allocation12] sm:$0xff] %v200_v56 }
 0x124   :  { %306 = dma.vmem_to_hbm [thread:$0]  %s302_s25, 128, %s304_s28, [#allocation13]  }
 0x126   :  { %v219_v60 = vpop.f32.mrf.mxu2 }
 0x127   :  { %v220_v63 = vadd.f32 %v219_v60, %v179_v58 }
 0x129   :  { %v352_v0 = vadd.f32 -5.0, %v220_v63 }
 0x12b   :  { %v224_v1 = vand.u32 2147483647, %v352_v0  ;;  %v223_v12 = vmax.f32 %v352_v0, 0.0 }
 0x12d   :  { %v225_v2 = vsub.f32 0.0, %v224_v1 }
 0x12f   :  { %v226_v3 = vmul.f32 1.442695, %v225_v2 }
 0x131   :  { %368 = vpow2.f32 %v226_v3 }
 0x137   :  { %v369_v4 = vpop.eup %368 }
 0x138   :  { %v228_v5 = vadd.f32 1.0, %v369_v4  ;;  %v231_v6 = vmul.f32 -0.5, %v369_v4  ;;  %v234_v8 = vand.u32 2147483647, %v369_v4 }
 0x13a   :  { %370 = vlog2.f32 %v228_v5  ;;  %v232_v7 = vadd.f32 1.0, %v231_v6  ;;  %vm235_vm1 = vcmp.lt.f32.partialorder %v234_v8, 0.0004427343 }
 0x13c   :  { %v233_v11 = vmul.f32 %v369_v4, %v232_v7 }
 0x140   :  { %v371_v9 = vpop.eup %370 }
 0x141   :  { %v230_v10 = vmul.f32 0.6931472, %v371_v9 }
 0x143   :  { %v236_v13 = vsel %vm235_vm1, %v233_v11, %v230_v10 }
 0x144   :  { %v237_v15 = vadd.f32 %v236_v13, %v223_v12 }
 0x146   :  { %283 = vst [vmem:[#allocation14] sm:$0xff] %v237_v15  ;;  %v239_v16 = vmul.f32 %v238_v14, %v237_v15 }
 0x147   :  { %317 = dma.vmem_to_hbm [thread:$0]  %s313_s15, 128, %s315_s17, [#allocation13]  }
 0x148   :  { %v240_v17 = vadd.f32 %v239_v16, %v200_v56 }
 0x14a   :  { %277 = vmatmul.f32.vlgmr.msra.gmra.mxu3 %v240_v17  ;;  %281 = vst [vmem:[#allocation11] sm:$0xff] %v240_v17 }
 0x14b   :  { %295 = dma.vmem_to_hbm [thread:$0]  %s291_s13, 128, %s293_s1, [#allocation4]  }
 0x1cd   :  { %v278_v19 = vpop.f32.mrf.mxu3 }
 0x1ce   :  { %v279_v20 = vadd.f32 %v367_v18, %v278_v19 }
 0x1d0   :  { %284 = vst [vmem:[#allocation15] sm:$0xff] %v279_v20 }
 0x1d1   :  { %328 = dma.vmem_to_hbm [thread:$0]  %s324_s8, 128, %s326_s0, [#allocation16]  }
 0x1d2   :  { %594 = dma.done.wait [#allocation4], 128  }
 0x1d3   :  { %595 = vsyncadd [#allocation4], 4294967168 }
 0x1d4   :  { %596 = dma.done.wait [#allocation13], 256  }
 0x1d5   :  { %597 = vsyncadd [#allocation13], 4294967040 }
 0x1d6   :  { %598 = dma.done.wait [#allocation16], 128  }
 0x1d7   :  { %599 = vsyncadd [#allocation16], 4294967168 }
 0x1d8   :  { %345 = vsyncpa [#allocation3], 1 }
 0x1d9   :  { %346 = vsyncpa [#allocation6], 1 }
 0x1da   :  { %347 = vsyncpa [#allocation9], 1 }
 0x1db   :  { %348 = vsyncpa [#allocation4], 1 }
 0x1dc   :  { %349 = vsyncpa [#allocation13], 1 }
 0x1dd   :  { %350 = vsyncpa [#allocation16], 1 }

</bundles_post_ra>
